<compile_context>
chip_gen: v7x
topology: tpu7x:2x2x1
jax: 0.10.0
libtpu: 0.0.40
codegen_flags: <defaults>
</compile_context>

<pallas_src>
import math

import jax
import jax.numpy as jnp
from jax.experimental import pallas as pl
from jax.experimental.pallas import tpu as pltpu


def _pe_add_kernel(x_ref, pe_ref, o_ref):
    # x_ref / o_ref: (block_rows, block_n); pe_ref: (1, block_n).
    # Pure VPU add; the single pe row broadcasts over the sublane axis.
    o_ref[...] = x_ref[...] + pe_ref[...]


def make_pe_table(d_model: int, max_len: int = 20, dtype=jnp.float32) -> jnp.ndarray:
    """Deterministic sinusoidal positional-encoding table, (max_len, d_model)."""
    position = jnp.arange(0, max_len, dtype=jnp.float32)[:, None]                 # (L, 1)
    div_term = jnp.exp(
        jnp.arange(0, d_model, 2, dtype=jnp.float32) * -(math.log(10000.0) / d_model)
    )                                                                              # (ceil(D/2),)
    angles = position * div_term                                                   # (L, ceil(D/2))
    pe = jnp.zeros((max_len, d_model), dtype=jnp.float32)
    pe = pe.at[:, 0::2].set(jnp.sin(angles))
    # Guard odd d_model: the cos half only has floor(D/2) columns.
    pe = pe.at[:, 1::2].set(jnp.cos(angles[:, : d_model // 2]))
    return pe.astype(dtype)


def _chip_config():
    """(target_block_bytes, vmem_limit_bytes) per TPU generation."""
    try:
        vmem = int(pltpu.get_tpu_info().vmem_capacity_bytes)
    except Exception:  # unknown chip / interpret mode: be conservative (v7x-like)
        vmem = 64 * 1024 * 1024
    if vmem <= 64 * 1024 * 1024:
        # v7x: 64 MiB physical VMEM per TC, ~3.2 TB/s HBM -> bigger blocks, tighter limit.
        return 4 * 1024 * 1024, 48 * 1024 * 1024
    # v5e / v6e: 128 MiB VMEM, slower HBM -> 2 MiB blocks already hide per-step overhead.
    return 2 * 1024 * 1024, 64 * 1024 * 1024


def _sublane_multiple(dtype) -> int:
    # (8,128) is the f32 tile; sub-32-bit dtypes pack rows along sublanes.
    return max(8, 32 // jnp.dtype(dtype).itemsize)


def _pick_block_rows(B: int, rows_budget: int, sub: int, force_split: bool) -> int:
    """Largest sublane-aligned row block <= rows_budget, preferring divisors of B."""
    if force_split:
        # Guarantee >=2 row blocks so the 'parallel' axis spans both v7x TensorCores.
        rows_budget = min(rows_budget, max(1, pl.cdiv(B, 2)))
    if rows_budget >= B:
        return B  # full extent: no divisibility requirement, no padding
    blk = min(B, max(sub, (rows_budget // sub) * sub))
    if blk == B:
        return B
    # Prefer a block size that divides B: avoids a padded trailing block (wasted traffic).
    for cand in range(blk, sub - 1, -sub):
        if B % cand == 0:
            return cand
    return blk


def positional_encoding_forward(
    x: jnp.ndarray, pe: jnp.ndarray, *, min_pallas_bytes: int = 256 * 1024
) -> jnp.ndarray:
    """x: (B, S, D); pe: (max_len, D).  Returns x + pe[:S] (eval-mode dropout = identity)."""
    B, S, D = x.shape
    N = S * D
    itemsize = jnp.dtype(x.dtype).itemsize
    total_bytes = B * N * itemsize
    pe_slice = pe[:S, :].astype(x.dtype)

    # Tiny tensors are pure launch / DMA-setup overhead in a custom kernel; let XLA fuse.
    if total_bytes < min_pallas_bytes:
        return x + pe_slice[None, :, :]

    # Lane-dense 2-D layout: last dim N is the lane axis -> unmasked wide stores.
    x2d = x.reshape(B, N)
    pe_row = pe_slice.reshape(1, N)

    target_block_bytes, vmem_limit = _chip_config()
    sub = _sublane_multiple(x.dtype)
    bytes_per_row = N * itemsize

    if bytes_per_row <= target_block_bytes:
        # Tile rows only; keep the full lane axis.
        rows_budget = max(1, target_block_bytes // bytes_per_row)
        block_rows = _pick_block_rows(
            B, rows_budget, sub, force_split=total_bytes > 4 * 1024 * 1024
        )
        block_n = N
    else:
        # Small-B / huge-row shapes: also tile the lane axis in multiples of 128 so blocks
        # stay bounded (and pipelined) instead of one giant VMEM-busting block.
        block_rows = B if B < sub else sub
        lanes_budget = max(128, target_block_bytes // (block_rows * itemsize))
        block_n = min(N, (lanes_budget // 128) * 128)

    grid = (pl.cdiv(B, block_rows), pl.cdiv(N, block_n))

    cost = pl.CostEstimate(
        flops=B * N,
        transcendentals=0,
        bytes_accessed=(2 * B * N + N) * itemsize,
    )

    out2d = pl.pallas_call(
        _pe_add_kernel,
        out_shape=jax.ShapeDtypeStruct((B, N), x.dtype),
        grid_spec=pltpu.PrefetchScalarGridSpec(
            num_scalar_prefetch=0,
            grid=grid,
            in_specs=[
                pl.BlockSpec((block_rows, block_n), lambda i, j: (i, j)),
                pl.BlockSpec((1, block_n), lambda i, j: (0, j)),
            ],
            out_specs=pl.BlockSpec((block_rows, block_n), lambda i, j: (i, j)),
        ),
        compiler_params=pltpu.CompilerParams(
            dimension_semantics=("parallel", "parallel"),
            vmem_limit_bytes=vmem_limit,
        ),
        cost_estimate=cost,
    )(x2d, pe_row)

    return out2d.reshape(B, S, D)


if __name__ == "__main__":
    # Small shapes consistent with the module: batch=2, seq=8, d_model=32, max_len=20.
    B, S, D = 2, 8, 32
    max_len = 20

    key = jax.random.PRNGKey(0)
    x_small = jax.random.normal(key, (B, S, D), dtype=jnp.float32)
    pe_small = make_pe_table(D, max_len=max_len, dtype=jnp.float32)

    # Force the Pallas path (this shape is below the bypass threshold) so the kernel
    # itself is exercised and verified.
    out_small = positional_encoding_forward(x_small, pe_small, min_pallas_bytes=0)
    out_small = jax.block_until_ready(out_small)
    ref_small = x_small + pe_small[None, :S, :]
    assert out_small.shape == (B, S, D)
    assert jnp.allclose(out_small, ref_small, atol=1e-6, rtol=1e-6)

    # Larger shape (8 MiB): exercises multi-block row tiling with >=2 grid steps
    # (both v7x TensorCores) and the default, chip-aware block sizing path.
    B2, S2, D2 = 2048, 16, 64
    x_big = jax.random.normal(jax.random.PRNGKey(0), (B2, S2, D2), dtype=jnp.float32)
    pe_big = make_pe_table(D2, max_len=max_len, dtype=jnp.float32)
    out_big = jax.block_until_ready(positional_encoding_forward(x_big, pe_big))
    ref_big = x_big + pe_big[None, :S2, :]
    assert jnp.allclose(out_big, ref_big, atol=1e-6, rtol=1e-6)

    print("KERNEL_OK")
</pallas_src>

<mosaic_0001>
module attributes {stable_mosaic.version = 11 : i64} {
  func.func @_pe_add_kernel(%arg0: i32, %arg1: i32, %arg2: memref<2x256xf32, #tpu.memory_space<vmem>>, %arg3: memref<1x256xf32, #tpu.memory_space<vmem>>, %arg4: memref<2x256xf32, #tpu.memory_space<vmem>>) attributes {dimension_semantics = [#tpu.dimension_semantics<parallel>, #tpu.dimension_semantics<parallel>], iteration_bounds = array<i64: 1, 1>, scalar_prefetch = 0 : i64, scratch_operands = 0 : i64, tpu.core_type = #tpu.core_type<tc>, window_params = [{transform_indices = @transform_0, window_bounds = array<i64: 2, 256>}, {transform_indices = @transform_1, window_bounds = array<i64: 1, 256>}, {transform_indices = @transform_2, window_bounds = array<i64: 2, 256>}]} {
    %c0 = arith.constant 0 : index
    %c0_0 = arith.constant 0 : index
    %0 = vector.load %arg2[%c0, %c0_0] : memref<2x256xf32, #tpu.memory_space<vmem>>, vector<2x256xf32>
    %c0_1 = arith.constant 0 : index
    %c0_2 = arith.constant 0 : index
    %1 = vector.load %arg3[%c0_1, %c0_2] : memref<1x256xf32, #tpu.memory_space<vmem>>, vector<1x256xf32>
    %2 = vector.broadcast %1 : vector<1x256xf32> to vector<2x256xf32>
    %3 = arith.addf %0, %2 : vector<2x256xf32>
    %c0_3 = arith.constant 0 : index
    %c0_4 = arith.constant 0 : index
    %4 = vector.load %arg4[%c0_3, %c0_4] : memref<2x256xf32, #tpu.memory_space<vmem>>, vector<2x256xf32>
    tpu.vector_store %arg4[%c0_3, %c0_4], %3 {strides = array<i32>} : memref<2x256xf32, #tpu.memory_space<vmem>>, vector<2x256xf32>,
    return
  }
  func.func @transform_0(%arg0: i32, %arg1: i32) -> (i32, i32) {
    %c0_i32 = arith.constant 0 : i32
    return %arg0, %arg1 : i32, i32
  }
  func.func @transform_1(%arg0: i32, %arg1: i32) -> (i32, i32) {
    %c0_i32 = arith.constant 0 : i32
    %c0_i32_0 = arith.constant 0 : i32
    return %c0_i32, %arg1 : i32, i32
  }
  func.func @transform_2(%arg0: i32, %arg1: i32) -> (i32, i32) {
    %c0_i32 = arith.constant 0 : i32
    return %arg0, %arg1 : i32, i32
  }
}

</mosaic_0001>

<bundles_post_ra>
// kernel: tpu_custom_call.1
= control target key start
LH: loop header
LB: loop body
LE: loop exit
PB: predicated region body
PF: predicated region fallthrough
CT: control target
= control target key end

     0   :  { %7 = vsyncpa [#allocation3], 0  ;;  %s157_s0 = inlined_call_operand.hbm [shape: f32[2,256], index: 0, kind: input, shape index: {}]   ;;  %s158_s1 = inlined_call_operand.vmem [shape: f32[1,256], index: 1, kind: input, shape index: {}]   ;;  %s159_s2 = inlined_call_operand.hbm [shape: f32[2,256], index: 2, kind: output, shape index: {}]  }
   0x1   :  { %8 = vsyncpa [#allocation4], 0  ;;  %s112_s9 = smov [#allocation2]   ;;  %s64_s13 = scalar_lea.hbm %s157_s0, 64 }
   0x2   :  { %s15_s10 = sshll.u32 %s112_s9, 4  ;;  %p65_p0 = scmp.ne.s32.totalorder %s157_s0, %s64_s13  ;;  %s16_s10 = int_to_ptr.vmem [resolvable:$true] %s15_s10 }
   0x3   :  { %p68_p1 = scmp.lt.u32.totalorder %s64_s13, %s157_s0 }
   0x5   :  { %p70_p2 = pnand %p68_p1, %p65_p0 }
   0x7   :  { %73 = shalt.err (!%p70_p2)
}
   0x8   :  { %s74_s18 = scalar_lea.vmem %s16_s10, 64  ;;  %p79_p4 = scmp.lt.s32.totalorder %s16_s10, %s16_s10 }
   0x9   :  { %p75_p3 = scmp.ne.s32.totalorder %s16_s10, %s74_s18  ;;  %p80_p5 = scmp.lt.s32.totalorder %s74_s18, %s74_s18 }
   0xb   :  { %p81_p6 = por %p80_p5, %p79_p4 }
   0xd   :  { %p82_p7 = pnand %p81_p6, %p75_p3 }
   0xf   :  { %85 = shalt.err (!%p82_p7)
}
  0x10   :  { %18 = dma.hbm_to_vmem [thread:$0]  %s157_s0, 64, %s16_s10, [#allocation3]  }
  0x11   :  { %108 = dma.done.wait [#allocation3], 64  }
  0x12   :  { %109 = vsyncadd [#allocation3], 4294967232  ;;  %v27_v0 = vlaneseq  ;;  %v113_v1 = vmov 1983009808   ;;  %v25_v7 = vld [vmem:[%s158_s1] sm:$0x3] }
  0x13   :  { %v37_v2 = vunpack.c.l.s4 %v113_v1  ;;  %v24_v12 = vld [vmem:[#allocation2] sm:$0xf]  ;;  %s114_s23 = smov [#allocation5]  }
  0x14   :  { %v28_v3 = vshrl.u32 %v27_v0, 7  ;;  %s52_s0 = sshll.u32 %s114_s23, 4  ;;  %s53_s0 = int_to_ptr.vmem [resolvable:$true] %s52_s0 }
  0x15   :  { %v38_v6 = vunpack.c.0.s8 %v37_v2  ;;  %s86_s24 = scalar_lea.vmem %s53_s0, 64  ;;  %p91_p9 = scmp.lt.s32.totalorder %s53_s0, %s53_s0 }
  0x16   :  { %v29_v4 = vsub.s32 0, %v28_v3  ;;  %v33_v5 = vsub.s32 1, %v28_v3  ;;  %p87_p8 = scmp.ne.s32.totalorder %s53_s0, %s86_s24  ;;  %p92_p10 = scmp.lt.s32.totalorder %s86_s24, %s86_s24 }
  0x17   :  { %v41_v10 = vsub.s32 %v38_v6, %v28_v3 }
  0x18   :  { %v30_v8 = vrot.slane %v25_v7, %v29_v4  ;;  %v34_v9 = vrot.slane %v25_v7, %v33_v5  ;;  %p93_p11 = por %p92_p10, %p91_p9 }
  0x1a   :  { %v35_v11 = vcombine.low %v30_v8, %v34_v9  ;;  %p94_p12 = pnand %p93_p11, %p87_p8 }
  0x1c   :  { %v42_v13 = vrot.slane %v35_v11, %v41_v10 }
  0x1e   :  { %v44_v14 = vadd.f32 %v42_v13, %v24_v12 }
  0x20   :  { %45 = vst [vmem:[#allocation5] sm:$0xf] %v44_v14 }
  0x21   :  { %97 = shalt.err (!%p94_p12)
}
  0x22   :  { %s98_s26 = scalar_lea.hbm %s159_s2, 64 }
  0x23   :  { %p99_p13 = scmp.ne.s32.totalorder %s159_s2, %s98_s26  ;;  %p102_p0 = scmp.lt.u32.totalorder %s98_s26, %s159_s2 }
  0x25   :  { %p104_p1 = pnand %p102_p0, %p99_p13 }
  0x27   :  { %107 = shalt.err (!%p104_p1)
}
  0x28   :  { %55 = dma.vmem_to_hbm [thread:$0]  %s53_s0, 64, %s159_s2, [#allocation4]  }
  0x29   :  { %110 = dma.done.wait [#allocation4], 64  }
  0x2a   :  { %111 = vsyncadd [#allocation4], 4294967232 }
  0x2b   :  { %59 = vsyncpa [#allocation3], 1 }
  0x2c   :  { %60 = vsyncpa [#allocation4], 1 }

</bundles_post_ra>
